<compile_context>
chip_gen: v5e
topology: v5e:2x2
jax: 0.10.0
libtpu: 0.0.40
codegen_flags: <defaults>
</compile_context>

<pallas_src>
import functools

import jax
import jax.numpy as jnp
import numpy as np
from jax.experimental import pallas as pl
from jax.experimental.pallas import tpu as pltpu


def _token_distill_kernel(inv_t_ref,    # scalar-prefetch: (1,) f32 in SMEM
                          logits_ref,   # (T, tile_n) student logits block
                          targets_ref,  # (T, tile_n) teacher logits block
                          labels_ref,   # (1, tile_n) int32
                          mask_ref,     # (1, tile_n) f32 (0/1)
                          acc_ref,      # (1, 8, 128) f32 per-core accumulator
                          *, n_tokens, tile_n):
    core = pl.program_id(0)
    step = pl.program_id(1)

    @pl.when(step == 0)
    def _():
        acc_ref[...] = jnp.zeros_like(acc_ref)

    # ---- validity of each lane (ragged last block / phantom per-core step) ----
    global_step = core * pl.num_programs(1) + step
    tok0 = global_step * tile_n
    lane = jax.lax.broadcasted_iota(jnp.int32, (1, tile_n), 1)
    valid = (tok0 + lane) < n_tokens                       # (1, tile_n) bool

    # Zero the garbage lanes BEFORE max/exp so inf/NaN can never reach the
    # accumulator (the OOB region of an overhanging block is unspecified).
    logits = jnp.where(valid, logits_ref[...].astype(jnp.float32), 0.0)   # (T, tn)
    targets = jnp.where(valid, targets_ref[...].astype(jnp.float32), 0.0)  # (T, tn)
    labels = labels_ref[...]                                               # (1, tn)
    mask = jnp.where(valid, mask_ref[...], 0.0)                            # (1, tn)

    inv_t = inv_t_ref[0]

    # ---- cross-entropy on student logits (hard labels), no materialized logp ----
    m_s = jnp.max(logits, axis=0, keepdims=True)           # (1, tn)
    sh_s = logits - m_s                                     # (T, tn)
    lse_s = jnp.log(jnp.sum(jnp.exp(sh_s), axis=0, keepdims=True))
    tag_iota = jax.lax.broadcasted_iota(jnp.int32, sh_s.shape, 0)
    picked = jnp.sum(jnp.where(tag_iota == labels, sh_s, 0.0),
                     axis=0, keepdims=True)                 # (1, tn)
    ce_rows = lse_s - picked                                # -log p[label]

    # ---- KD cross-entropy vs teacher at temperature T ----
    # inv_t > 0  =>  max(logits*inv_t) == m_s*inv_t, so reuse sh_s directly.
    sh_bs = sh_s * inv_t                                    # (T, tn)
    lse_bs = jnp.log(jnp.sum(jnp.exp(sh_bs), axis=0, keepdims=True))

    m_t = jnp.max(targets, axis=0, keepdims=True)
    e_t = jnp.exp((targets - m_t) * inv_t)                  # unnormalized teacher probs
    z_t = jnp.sum(e_t, axis=0, keepdims=True)               # (1, tn)
    s_num = jnp.sum(e_t * sh_bs, axis=0, keepdims=True)     # (1, tn)

    # Row divide on the EUP; one Newton step keeps it f32-exact.
    z_inv = pl.reciprocal(z_t, approx=True)
    z_inv = z_inv * (2.0 - z_t * z_inv)
    kd_rows = lse_bs - s_num * z_inv                        # -sum(p_t * logp_s)

    ce_s = jnp.sum(ce_rows * mask)
    kd_s = jnp.sum(kd_rows * mask)
    cnt_s = jnp.sum(mask)

    lane3 = jax.lax.broadcasted_iota(jnp.int32, acc_ref.shape, 2)
    upd = (jnp.where(lane3 == 0, ce_s, 0.0)
           + jnp.where(lane3 == 1, kd_s, 0.0)
           + jnp.where(lane3 == 2, cnt_s, 0.0))
    acc_ref[...] += upd


def _round_up(x, m):
    return -(-x // m) * m


@functools.lru_cache(maxsize=1)
def _tpu_defaults():
    """(num_cores, vmem_limit_bytes) chosen per TPU generation.

    v7x: 2 TensorCores/chip, 64 MiB VMEM per core -> 2-way parallel axis, 48 MiB.
    v5e/v6e: 1 TC, 128 MiB VMEM -> single core, ~100 MiB limit.
    Conservative fallback works on every generation.
    """
    vmem_cap = 64 << 20
    try:
        vmem_cap = int(pltpu.get_tpu_info().vmem_capacity_bytes)
    except Exception:
        pass
    try:
        kind = jax.devices()[0].device_kind.lower()
    except Exception:
        kind = ""
    cores = 1
    if "v7" in kind:
        cores = 2
        vmem_cap = min(vmem_cap, 64 << 20)
    vmem_limit = max(32 << 20, min(vmem_cap - (16 << 20), 100 << 20))
    return cores, vmem_limit


def _pick_tile_n(n_tokens, num_tags, itemsize, num_cores, vmem_budget_bytes,
                 max_tile=64 * 1024):
    """Largest lane-multiple token tile whose streamed blocks + temps fit VMEM."""
    sublane = 8 * max(1, 4 // itemsize)                 # 8 for f32, 16 for bf16
    t_pad = _round_up(num_tags, sublane)
    # double-buffered streams: student + teacher blocks plus labels/mask rows
    stream = 2 * (2 * t_pad * itemsize + 2 * 8 * 4)
    # a few live f32 (T, tile_n) temporaries inside the kernel (single-buffered)
    temps = 4 * _round_up(num_tags, 8) * 4
    per_token = stream + temps
    tile = (vmem_budget_bytes // per_token) // 128 * 128
    tile = max(128, min(tile, max_tile))
    # never bigger than one core's (lane-rounded) share of tokens
    tile = min(tile, _round_up(max(1, -(-n_tokens // num_cores)), 128))
    return tile


@functools.partial(jax.jit, static_argnames=("tile_n", "num_cores"))
def token_distill_loss(logits, labels, attention_mask, targets, temperature,
                       *, tile_n=None, num_cores=None):
    """loss = CE(active_logits, active_labels) + kd_ce(active_logits, active_targets, T)."""
    B, S, T = logits.shape
    N = B * S
    itemsize = jnp.dtype(logits.dtype).itemsize

    cores_default, vmem_limit = _tpu_defaults()
    if num_cores is None:
        num_cores = cores_default
    if tile_n is None:
        tile_n = _pick_tile_n(N, T, itemsize, num_cores, vmem_limit - (8 << 20))

    steps_total = -(-N // tile_n)
    steps_per_core = -(-steps_total // num_cores)
    last_blk = steps_total - 1

    # token-on-lane layout; dtype preserved (bf16 streams half the HBM bytes).
    # TODO(synk): fuse this transpose into the producing projection (emit (T, N)
    # directly) to drop the remaining extra HBM pass.
    logits_t = logits.reshape(N, T).swapaxes(0, 1)          # (T, N)
    targets_t = targets.reshape(N, T).swapaxes(0, 1)        # (T, N)
    labels_t = labels.reshape(1, N).astype(jnp.int32)       # (1, N)
    mask_t = attention_mask.reshape(1, N).astype(jnp.float32)
    # NOTE: no jnp.pad — the ragged tail is masked inside the kernel.

    inv_temp = (1.0 / jnp.asarray(temperature, jnp.float32)).reshape(1)

    spc = steps_per_core  # static python int captured by the index maps

    def data_map(c, i, inv_t):
        # clamp phantom per-core steps onto the last real block; their
        # contribution is zeroed in-kernel via the global token index.
        return (0, jnp.minimum(c * spc + i, last_blk))

    def out_map(c, i, inv_t):
        return (c, 0, 0)

    kernel = functools.partial(_token_distill_kernel, n_tokens=N, tile_n=tile_n)

    acc = pl.pallas_call(
        kernel,
        out_shape=jax.ShapeDtypeStruct((num_cores, 8, 128), jnp.float32),
        grid_spec=pltpu.PrefetchScalarGridSpec(
            num_scalar_prefetch=1,
            grid=(num_cores, steps_per_core),
            in_specs=[
                pl.BlockSpec((T, tile_n), data_map),
                pl.BlockSpec((T, tile_n), data_map),
                pl.BlockSpec((1, tile_n), data_map),
                pl.BlockSpec((1, tile_n), data_map),
            ],
            out_specs=pl.BlockSpec((1, 8, 128), out_map),
        ),
        compiler_params=pltpu.CompilerParams(
            dimension_semantics=("parallel", "arbitrary"),
            vmem_limit_bytes=vmem_limit),
    )(inv_temp, logits_t, targets_t, labels_t, mask_t)

    ce_sum = jnp.sum(acc[:, 0, 0])
    kd_sum = jnp.sum(acc[:, 0, 1])
    cnt = jnp.sum(acc[:, 0, 2])

    # means over active tokens (PyTorch: boolean-index then reduction='mean';
    # NaN if every token is masked, matching torch's mean over empty selection)
    return (ce_sum + kd_sum) / cnt


def constant_temperature_scheduler(active_logits, active_target):
    # Deterministic stand-in for the configurable temperature_scheduler.
    return 4.0


def _reference_loss(logits, labels, attention_mask, targets, temperature):
    """Pure-JAX reference mirroring the PyTorch semantics."""
    B, S, T = logits.shape
    lf = logits.reshape(-1, T).astype(jnp.float32)
    tf = targets.reshape(-1, T).astype(jnp.float32)
    lab = labels.reshape(-1)
    msk = attention_mask.reshape(-1).astype(jnp.float32)
    cnt = jnp.sum(msk)

    logp = jax.nn.log_softmax(lf, axis=-1)
    ce_rows = -jnp.take_along_axis(logp, lab[:, None], axis=-1)[:, 0]
    ce = jnp.sum(ce_rows * msk) / cnt

    p_t = jax.nn.softmax(tf / temperature, axis=-1)
    logp_s = jax.nn.log_softmax(lf / temperature, axis=-1)
    kd_rows = -jnp.sum(p_t * logp_s, axis=-1)
    kd = jnp.sum(kd_rows * msk) / cnt
    return ce + kd


if __name__ == "__main__":
    B, S, T = 2, 8, 8   # batch, seq, num_tags
    key = jax.random.PRNGKey(0)
    k1, k2, k3, k4 = jax.random.split(key, 4)

    logits = jax.random.normal(k1, (B, S, T), jnp.float32)
    targets = jax.random.normal(k2, (B, S, T), jnp.float32)        # teacher logits
    labels = jax.random.randint(k3, (B, S), 0, T, jnp.int32)
    # attention mask: first rows active, a few trailing tokens masked out
    lens = jnp.array([S, S - 3], jnp.int32)
    attention_mask = (jnp.arange(S)[None, :] < lens[:, None]).astype(jnp.int32)

    temperature = constant_temperature_scheduler(logits, targets)

    loss = token_distill_loss(logits, labels, attention_mask, targets, temperature)
    loss = jax.block_until_ready(loss)

    ref = _reference_loss(logits, labels, attention_mask, targets, temperature)
    np.testing.assert_allclose(np.asarray(loss), np.asarray(ref), rtol=1e-4, atol=1e-4)

    print("KERNEL_OK")
</pallas_src>

<mosaic_0001>
module attributes {stable_mosaic.version = 11 : i64} {
  func.func @_token_distill_kernel(%arg0: i32, %arg1: i32, %arg2: memref<1xf32, #tpu.memory_space<smem>>, %arg3: memref<8x128xf32, #tpu.memory_space<vmem>>, %arg4: memref<8x128xf32, #tpu.memory_space<vmem>>, %arg5: memref<1x128xi32, #tpu.memory_space<vmem>>, %arg6: memref<1x128xf32, #tpu.memory_space<vmem>>, %arg7: memref<1x8x128xf32, #tpu.memory_space<vmem>>) attributes {dimension_semantics = [#tpu.dimension_semantics<parallel>, #tpu.dimension_semantics<arbitrary>], iteration_bounds = array<i64: 1, 1>, scalar_prefetch = 1 : i64, scratch_operands = 0 : i64, tpu.core_type = #tpu.core_type<tc>, window_params = [{transform_indices = @transform_0, window_bounds = array<i64: 8, 128>}, {transform_indices = @transform_1, window_bounds = array<i64: 8, 128>}, {transform_indices = @transform_2, window_bounds = array<i64: 1, 128>}, {transform_indices = @transform_3, window_bounds = array<i64: 1, 128>}, {transform_indices = @transform_4, window_bounds = array<i64: 1, 8, 128>}]} {
    %c0_i32 = arith.constant 0 : i32
    %0 = arith.cmpi eq, %arg1, %c0_i32 : i32
    %1 = arith.extui %0 : i1 to i32
    %c0_i32_0 = arith.constant 0 : i32
    %2 = arith.cmpi ne, %1, %c0_i32_0 : i32
    scf.if %2 {
      %cst_34 = arith.constant 0.000000e+00 : f32
      %102 = vector.broadcast %cst_34 : f32 to vector<1x8x128xf32>
      %c0_35 = arith.constant 0 : index
      %c0_36 = arith.constant 0 : index
      %c0_37 = arith.constant 0 : index
      %103 = vector.load %arg7[%c0_35, %c0_36, %c0_37] : memref<1x8x128xf32, #tpu.memory_space<vmem>>, vector<1x8x128xf32>
      tpu.vector_store %arg7[%c0_35, %c0_36, %c0_37], %102 {strides = array<i32>} : memref<1x8x128xf32, #tpu.memory_space<vmem>>, vector<1x8x128xf32>,
    } else {
    }
    %c1_i32 = arith.constant 1 : i32
    %3 = arith.muli %arg0, %c1_i32 : i32
    %4 = arith.addi %3, %arg1 : i32
    %c128_i32 = arith.constant 128 : i32
    %5 = arith.muli %4, %c128_i32 : i32
    %6 = tpu.iota {dimensions = array<i32: 1>} : vector<1x128xi32>
    %7 = vector.broadcast %5 : i32 to vector<1x128xi32>
    %8 = arith.addi %7, %6 : vector<1x128xi32>
    %c16_i32 = arith.constant 16 : i32
    %9 = vector.broadcast %c16_i32 : i32 to vector<1x128xi32>
    %10 = arith.cmpi slt, %8, %9 : vector<1x128xi32>
    %c0 = arith.constant 0 : index
    %c0_1 = arith.constant 0 : index
    %11 = vector.load %arg3[%c0, %c0_1] : memref<8x128xf32, #tpu.memory_space<vmem>>, vector<8x128xf32>
    %cst = arith.constant 0.000000e+00 : f32
    %12 = vector.shape_cast %10 : vector<1x128xi1> to vector<1x128xi1>
    %13 = vector.broadcast %12 : vector<1x128xi1> to vector<8x128xi1>
    %14 = vector.broadcast %cst : f32 to vector<8x128xf32>
    %15 = arith.select %13, %11, %14 : vector<8x128xi1>, vector<8x128xf32>
    %c0_2 = arith.constant 0 : index
    %c0_3 = arith.constant 0 : index
    %16 = vector.load %arg4[%c0_2, %c0_3] : memref<8x128xf32, #tpu.memory_space<vmem>>, vector<8x128xf32>
    %cst_4 = arith.constant 0.000000e+00 : f32
    %17 = vector.shape_cast %10 : vector<1x128xi1> to vector<1x128xi1>
    %18 = vector.broadcast %17 : vector<1x128xi1> to vector<8x128xi1>
    %19 = vector.broadcast %cst_4 : f32 to vector<8x128xf32>
    %20 = arith.select %18, %16, %19 : vector<8x128xi1>, vector<8x128xf32>
    %c0_5 = arith.constant 0 : index
    %c0_6 = arith.constant 0 : index
    %21 = vector.load %arg5[%c0_5, %c0_6] : memref<1x128xi32, #tpu.memory_space<vmem>>, vector<1x128xi32>
    %c0_7 = arith.constant 0 : index
    %c0_8 = arith.constant 0 : index
    %22 = vector.load %arg6[%c0_7, %c0_8] : memref<1x128xf32, #tpu.memory_space<vmem>>, vector<1x128xf32>
    %cst_9 = arith.constant 0.000000e+00 : f32
    %23 = vector.broadcast %cst_9 : f32 to vector<1x128xf32>
    %24 = arith.select %10, %22, %23 : vector<1x128xi1>, vector<1x128xf32>
    %c0_10 = arith.constant 0 : index
    %25 = memref.load %arg2[%c0_10] : memref<1xf32, #tpu.memory_space<smem>>
    %cst_11 = arith.constant dense<0xFF800000> : vector<128xf32>
    %26 = vector.multi_reduction <maximumf>, %15, %cst_11 [0] : vector<8x128xf32> to vector<128xf32>
    %27 = vector.shape_cast %26 : vector<128xf32> to vector<1x128xf32>
    %28 = vector.broadcast %27 : vector<1x128xf32> to vector<8x128xf32>
    %29 = arith.subf %15, %28 : vector<8x128xf32>
    %30 = math.exp %29 : vector<8x128xf32>
    %cst_12 = arith.constant dense<0.000000e+00> : vector<128xf32>
    %31 = vector.multi_reduction <add>, %30, %cst_12 [0] : vector<8x128xf32> to vector<128xf32>
    %32 = vector.shape_cast %31 : vector<128xf32> to vector<1x128xf32>
    %33 = math.log %32 : vector<1x128xf32>
    %34 = tpu.iota {dimensions = array<i32: 0>} : vector<8x128xi32>
    %35 = vector.broadcast %21 : vector<1x128xi32> to vector<8x128xi32>
    %36 = arith.cmpi eq, %34, %35 : vector<8x128xi32>
    %cst_13 = arith.constant 0.000000e+00 : f32
    %37 = vector.broadcast %cst_13 : f32 to vector<8x128xf32>
    %38 = arith.select %36, %29, %37 : vector<8x128xi1>, vector<8x128xf32>
    %cst_14 = arith.constant dense<0.000000e+00> : vector<128xf32>
    %39 = vector.multi_reduction <add>, %38, %cst_14 [0] : vector<8x128xf32> to vector<128xf32>
    %40 = vector.shape_cast %39 : vector<128xf32> to vector<1x128xf32>
    %41 = arith.subf %33, %40 : vector<1x128xf32>
    %42 = vector.broadcast %25 : f32 to vector<8x128xf32>
    %43 = arith.mulf %29, %42 : vector<8x128xf32>
    %44 = math.exp %43 : vector<8x128xf32>
    %cst_15 = arith.constant dense<0.000000e+00> : vector<128xf32>
    %45 = vector.multi_reduction <add>, %44, %cst_15 [0] : vector<8x128xf32> to vector<128xf32>
    %46 = vector.shape_cast %45 : vector<128xf32> to vector<1x128xf32>
    %47 = math.log %46 : vector<1x128xf32>
    %cst_16 = arith.constant dense<0xFF800000> : vector<128xf32>
    %48 = vector.multi_reduction <maximumf>, %20, %cst_16 [0] : vector<8x128xf32> to vector<128xf32>
    %49 = vector.shape_cast %48 : vector<128xf32> to vector<1x128xf32>
    %50 = vector.broadcast %49 : vector<1x128xf32> to vector<8x128xf32>
    %51 = arith.subf %20, %50 : vector<8x128xf32>
    %52 = vector.broadcast %25 : f32 to vector<8x128xf32>
    %53 = arith.mulf %51, %52 : vector<8x128xf32>
    %54 = math.exp %53 : vector<8x128xf32>
    %cst_17 = arith.constant dense<0.000000e+00> : vector<128xf32>
    %55 = vector.multi_reduction <add>, %54, %cst_17 [0] : vector<8x128xf32> to vector<128xf32>
    %56 = vector.shape_cast %55 : vector<128xf32> to vector<1x128xf32>
    %57 = arith.mulf %54, %43 : vector<8x128xf32>
    %cst_18 = arith.constant dense<0.000000e+00> : vector<128xf32>
    %58 = vector.multi_reduction <add>, %57, %cst_18 [0] : vector<8x128xf32> to vector<128xf32>
    %59 = vector.shape_cast %58 : vector<128xf32> to vector<1x128xf32>
    %60 = tpu.reciprocal %56 {approx = true} : vector<1x128xf32> -> vector<1x128xf32>
    %61 = arith.mulf %56, %60 : vector<1x128xf32>
    %cst_19 = arith.constant 2.000000e+00 : f32
    %62 = vector.broadcast %cst_19 : f32 to vector<1x128xf32>
    %63 = arith.subf %62, %61 : vector<1x128xf32>
    %64 = arith.mulf %60, %63 : vector<1x128xf32>
    %65 = arith.mulf %59, %64 : vector<1x128xf32>
    %66 = arith.subf %47, %65 : vector<1x128xf32>
    %67 = arith.mulf %41, %24 : vector<1x128xf32>
    %68 = vector.shape_cast %67 : vector<1x128xf32> to vector<1x1x128xf32>
    %cst_20 = arith.constant dense<0.000000e+00> : vector<1xf32>
    %69 = vector.multi_reduction <add>, %68, %cst_20 [1, 2] : vector<1x1x128xf32> to vector<1xf32>
    %70 = vector.shape_cast %69 : vector<1xf32> to vector<1x1x1xf32>
    %71 = vector.extract %70[0, 0, 0] : f32 from vector<1x1x1xf32>
    %72 = arith.mulf %66, %24 : vector<1x128xf32>
    %73 = vector.shape_cast %72 : vector<1x128xf32> to vector<1x1x128xf32>
    %cst_21 = arith.constant dense<0.000000e+00> : vector<1xf32>
    %74 = vector.multi_reduction <add>, %73, %cst_21 [1, 2] : vector<1x1x128xf32> to vector<1xf32>
    %75 = vector.shape_cast %74 : vector<1xf32> to vector<1x1x1xf32>
    %76 = vector.extract %75[0, 0, 0] : f32 from vector<1x1x1xf32>
    %77 = vector.shape_cast %24 : vector<1x128xf32> to vector<1x1x128xf32>
    %cst_22 = arith.constant dense<0.000000e+00> : vector<1xf32>
    %78 = vector.multi_reduction <add>, %77, %cst_22 [1, 2] : vector<1x1x128xf32> to vector<1xf32>
    %79 = vector.shape_cast %78 : vector<1xf32> to vector<1x1x1xf32>
    %80 = vector.extract %79[0, 0, 0] : f32 from vector<1x1x1xf32>
    %81 = tpu.iota {dimensions = array<i32: 2>} : vector<1x8x128xi32>
    %c0_i32_23 = arith.constant 0 : i32
    %82 = vector.broadcast %c0_i32_23 : i32 to vector<1x8x128xi32>
    %83 = arith.cmpi eq, %81, %82 : vector<1x8x128xi32>
    %cst_24 = arith.constant 0.000000e+00 : f32
    %84 = vector.broadcast %71 : f32 to vector<1x8x128xf32>
    %85 = vector.broadcast %cst_24 : f32 to vector<1x8x128xf32>
    %86 = arith.select %83, %84, %85 : vector<1x8x128xi1>, vector<1x8x128xf32>
    %c1_i32_25 = arith.constant 1 : i32
    %87 = vector.broadcast %c1_i32_25 : i32 to vector<1x8x128xi32>
    %88 = arith.cmpi eq, %81, %87 : vector<1x8x128xi32>
    %cst_26 = arith.constant 0.000000e+00 : f32
    %89 = vector.broadcast %76 : f32 to vector<1x8x128xf32>
    %90 = vector.broadcast %cst_26 : f32 to vector<1x8x128xf32>
    %91 = arith.select %88, %89, %90 : vector<1x8x128xi1>, vector<1x8x128xf32>
    %92 = arith.addf %86, %91 : vector<1x8x128xf32>
    %c2_i32 = arith.constant 2 : i32
    %93 = vector.broadcast %c2_i32 : i32 to vector<1x8x128xi32>
    %94 = arith.cmpi eq, %81, %93 : vector<1x8x128xi32>
    %cst_27 = arith.constant 0.000000e+00 : f32
    %95 = vector.broadcast %80 : f32 to vector<1x8x128xf32>
    %96 = vector.broadcast %cst_27 : f32 to vector<1x8x128xf32>
    %97 = arith.select %94, %95, %96 : vector<1x8x128xi1>, vector<1x8x128xf32>
    %98 = arith.addf %92, %97 : vector<1x8x128xf32>
    %c0_28 = arith.constant 0 : index
    %c0_29 = arith.constant 0 : index
    %c0_30 = arith.constant 0 : index
    %99 = vector.load %arg7[%c0_28, %c0_29, %c0_30] : memref<1x8x128xf32, #tpu.memory_space<vmem>>, vector<1x8x128xf32>
    %100 = arith.addf %99, %98 : vector<1x8x128xf32>
    %c0_31 = arith.constant 0 : index
    %c0_32 = arith.constant 0 : index
    %c0_33 = arith.constant 0 : index
    %101 = vector.load %arg7[%c0_31, %c0_32, %c0_33] : memref<1x8x128xf32, #tpu.memory_space<vmem>>, vector<1x8x128xf32>
    tpu.vector_store %arg7[%c0_31, %c0_32, %c0_33], %100 {strides = array<i32>} : memref<1x8x128xf32, #tpu.memory_space<vmem>>, vector<1x8x128xf32>,
    return
  }
  func.func @transform_0(%arg0: i32, %arg1: i32, %arg2: memref<1xf32, #tpu.memory_space<smem>>) -> (i32, i32) {
    %c1_i32 = arith.constant 1 : i32
    %0 = arith.muli %arg0, %c1_i32 : i32
    %1 = arith.addi %0, %arg1 : i32
    %c0_i32 = arith.constant 0 : i32
    %2 = arith.minsi %1, %c0_i32 : i32
    %c0_i32_0 = arith.constant 0 : i32
    %c0_i32_1 = arith.constant 0 : i32
    return %c0_i32_0, %2 : i32, i32
  }
  func.func @transform_1(%arg0: i32, %arg1: i32, %arg2: memref<1xf32, #tpu.memory_space<smem>>) -> (i32, i32) {
    %c1_i32 = arith.constant 1 : i32
    %0 = arith.muli %arg0, %c1_i32 : i32
    %1 = arith.addi %0, %arg1 : i32
    %c0_i32 = arith.constant 0 : i32
    %2 = arith.minsi %1, %c0_i32 : i32
    %c0_i32_0 = arith.constant 0 : i32
    %c0_i32_1 = arith.constant 0 : i32
    return %c0_i32_0, %2 : i32, i32
  }
  func.func @transform_2(%arg0: i32, %arg1: i32, %arg2: memref<1xf32, #tpu.memory_space<smem>>) -> (i32, i32) {
    %c1_i32 = arith.constant 1 : i32
    %0 = arith.muli %arg0, %c1_i32 : i32
    %1 = arith.addi %0, %arg1 : i32
    %c0_i32 = arith.constant 0 : i32
    %2 = arith.minsi %1, %c0_i32 : i32
    %c0_i32_0 = arith.constant 0 : i32
    %c0_i32_1 = arith.constant 0 : i32
    return %c0_i32_0, %2 : i32, i32
  }
  func.func @transform_3(%arg0: i32, %arg1: i32, %arg2: memref<1xf32, #tpu.memory_space<smem>>) -> (i32, i32) {
    %c1_i32 = arith.constant 1 : i32
    %0 = arith.muli %arg0, %c1_i32 : i32
    %1 = arith.addi %0, %arg1 : i32
    %c0_i32 = arith.constant 0 : i32
    %2 = arith.minsi %1, %c0_i32 : i32
    %c0_i32_0 = arith.constant 0 : i32
    %c0_i32_1 = arith.constant 0 : i32
    return %c0_i32_0, %2 : i32, i32
  }
  func.func @transform_4(%arg0: i32, %arg1: i32, %arg2: memref<1xf32, #tpu.memory_space<smem>>) -> (i32, i32, i32) {
    %c0_i32 = arith.constant 0 : i32
    %c0_i32_0 = arith.constant 0 : i32
    %c0_i32_1 = arith.constant 0 : i32
    return %arg0, %c0_i32, %c0_i32_0 : i32, i32, i32
  }
}

</mosaic_0001>

<bundles_post_ra>
// kernel: token_distill_loss.1
= control target key start
LH: loop header
LB: loop body
LE: loop exit
PB: predicated region body
PF: predicated region fallthrough
CT: control target
= control target key end

     0   :  { %v128_v0 = vlaneseq  ;;  %vm214_vm2 = vcmask 1040384   ;;  %s365_s1 = inlined_call_operand.vmem [shape: f32[8,16], index: 1, kind: input, shape index: {}]   ;;  %s366_s2 = inlined_call_operand.vmem [shape: f32[8,16], index: 2, kind: input, shape index: {}]   ;;  %s367_s3 = inlined_call_operand.vmem [shape: s32[1,16], index: 3, kind: input, shape index: {}]   ;;  %s368_s0 = inlined_call_operand.<no memory space> [shape: f32[1], index: 0, kind: input, shape index: {}]   ;;  %s369_s4 = inlined_call_operand.vmem [shape: f32[1,16], index: 4, kind: input, shape index: {}]   ;;  %s370_s5 = inlined_call_operand.vmem [shape: f32[1,8,128], index: 5, kind: output, shape index: {}]  }
   0x1   :  { %v133_v2 = vld [vmem:[%s365_s1] sm:$0xff]  ;;  %v172_v22 = vstv %s368_s0 }
   0x2   :  { %v332_v1 = vand.u32 127, %v128_v0  ;;  %v137_v3 = vld [vmem:[%s366_s2] sm:$0xff]  ;;  %v161_v17 = vshrl.u32 %v128_v0, 7 }
   0x3   :  { %v289_v18 = vld [vmem:[%s367_s3] ss:$0 sm:$0xff] }
   0x4   :  { %vm132_vm0 = vcmp.lt.s32.totalorder %v332_v1, 16  ;;  %v140_v23 = vld [vmem:[%s369_s4] sm:$0x1]  ;;  %vm163_vm1 = vcmp.eq.s32.totalorder %v161_v17, %v289_v18  ;;  %vm246_vm3 = vcmp.eq.s32.totalorder %v332_v1, 0  ;;  %vm249_vm4 = vcmp.eq.s32.totalorder %v332_v1, 1 }
   0x5   :  { %v136_v4 = vsel %vm132_vm0, %v133_v2, 0.0  ;;  %v138_v5 = vsel %vm132_vm0, %v137_v3, 0.0  ;;  %v141_v27 = vsel %vm132_vm0, %v140_v23, 0.0  ;;  %vm253_vm5 = vcmp.eq.s32.totalorder %v332_v1, 2 }
   0x6   :  { %v143_v6 = vrot.slane %v136_v4, 4  ;;  %v184_v7 = vrot.slane %v138_v5, 4  ;;  %v236_v31 = vsel %vm214_vm2, %v141_v27, 0.0 }
   0x7   :  { %237 = vadd.xlane.f32.xlu1 %v236_v31 }
   0x8   :  { %v144_v8 = vmax.f32 %v136_v4, %v143_v6  ;;  %v185_v9 = vmax.f32 %v138_v5, %v184_v7 }
   0xa   :  { %v145_v10 = vrot.slane %v144_v8, 2  ;;  %v186_v11 = vrot.slane %v185_v9, 2 }
   0xc   :  { %v146_v12 = vmax.f32 %v144_v8, %v145_v10  ;;  %v187_v13 = vmax.f32 %v185_v9, %v186_v11 }
   0xe   :  { %v147_v14 = vrot.slane %v146_v12, 1  ;;  %v188_v15 = vrot.slane %v187_v13, 1 }
  0x10   :  { %v148_v16 = vmax.f32 %v146_v12, %v147_v14  ;;  %v189_v19 = vmax.f32 %v187_v13, %v188_v15 }
  0x12   :  { %v149_v20 = vsub.f32 %v136_v4, %v148_v16  ;;  %v190_v21 = vsub.f32 %v138_v5, %v189_v19 }
  0x14   :  { %v150_v24 = vmul.f32 1.442695, %v149_v20  ;;  %v173_v25 = vmul.f32 %v172_v22, %v149_v20  ;;  %v191_v26 = vmul.f32 %v190_v21, %v172_v22  ;;  %v164_v29 = vsel %vm163_vm1, %v149_v20, 0.0 }
  0x15   :  { %v165_v32 = vrot.slane %v164_v29, 4 }
  0x16   :  { %290 = vpow2.f32 %v150_v24  ;;  %v174_v28 = vmul.f32 1.442695, %v173_v25  ;;  %v192_v30 = vmul.f32 1.442695, %v191_v26 }
  0x17   :  { %v166_v36 = vadd.f32 %v165_v32, %v164_v29 }
  0x18   :  { %292 = vpow2.f32 %v174_v28 }
  0x19   :  { %294 = vpow2.f32 %v192_v30  ;;  %v167_v44 = vrot.slane %v166_v36, 2 }
  0x1b   :  { %v168_v53 = vadd.f32 %v167_v44, %v166_v36 }
  0x1c   :  { %v291_v33 = vpop.eup %290 }
  0x1d   :  { %v152_v34 = vrot.slane %v291_v33, 4  ;;  %v169_v59 = vrot.slane %v168_v53, 1 }
  0x1e   :  { %v293_v35 = vpop.eup %292 }
  0x1f   :  { %v295_v37 = vpop.eup %294  ;;  %v153_v38 = vadd.f32 %v291_v33, %v152_v34  ;;  %v176_v39 = vrot.slane %v293_v35, 4  ;;  %v170_v63 = vadd.f32 %v169_v59, %v168_v53 }
  0x20   :  { %v194_v40 = vrot.slane %v295_v37, 4  ;;  %v200_v41 = vmul.f32 %v295_v37, %v173_v25 }
  0x21   :  { %v154_v42 = vrot.slane %v153_v38, 2  ;;  %v177_v43 = vadd.f32 %v293_v35, %v176_v39 }
  0x22   :  { %v195_v45 = vadd.f32 %v295_v37, %v194_v40  ;;  %v201_v46 = vrot.slane %v200_v41, 4 }
  0x23   :  { %v155_v47 = vadd.f32 %v154_v42, %v153_v38  ;;  %v178_v48 = vrot.slane %v177_v43, 2 }
  0x24   :  { %v196_v49 = vrot.slane %v195_v45, 2  ;;  %v202_v52 = vadd.f32 %v201_v46, %v200_v41 }
  0x25   :  { %v156_v50 = vrot.slane %v155_v47, 1  ;;  %v179_v51 = vadd.f32 %v178_v48, %v177_v43 }
  0x26   :  { %v197_v54 = vadd.f32 %v196_v49, %v195_v45  ;;  %v203_v58 = vrot.slane %v202_v52, 2 }
  0x27   :  { %v157_v55 = vadd.f32 %v156_v50, %v155_v47  ;;  %v180_v56 = vrot.slane %v179_v51, 1 }
  0x28   :  { %v198_v57 = vrot.slane %v197_v54, 1  ;;  %v204_v62 = vadd.f32 %v203_v58, %v202_v52 }
  0x29   :  { %296 = vlog2.f32 %v157_v55  ;;  %v181_v60 = vadd.f32 %v180_v56, %v179_v51 }
  0x2a   :  { %v199_v61 = vadd.f32 %v198_v57, %v197_v54  ;;  %v205_v3 = vrot.slane %v204_v62, 1 }
  0x2c   :  { %298 = vrcp.f32 %v199_v61  ;;  %v206_v9 = vadd.f32 %v205_v3, %v204_v62 }
  0x2d   :  { %300 = vlog2.f32 %v181_v60 }
  0x2f   :  { %v297_v0 = vpop.eup %296 }
  0x30   :  { %v159_v2 = vmul.f32 0.6931472, %v297_v0 }
  0x32   :  { %v299_v4 = vpop.eup %298  ;;  %v171_v5 = vsub.f32 %v159_v2, %v170_v63 }
  0x33   :  { %v208_v6 = vmul.f32 %v299_v4, %v199_v61  ;;  %v301_v7 = vpop.eup %300 }
  0x34   :  { %v213_v8 = vmul.f32 %v171_v5, %v141_v27  ;;  %v183_v12 = vmul.f32 0.6931472, %v301_v7 }
  0x35   :  { %v209_v10 = vsub.f32 2.0, %v208_v6 }
  0x36   :  { %v215_v11 = vsel %vm214_vm2, %v213_v8, 0.0 }
  0x37   :  { %216 = vadd.xlane.f32.xlu0 %v215_v11  ;;  %v210_v13 = vmul.f32 %v299_v4, %v209_v10 }
  0x39   :  { %v211_v14 = vmul.f32 %v210_v13, %v206_v9 }
  0x3b   :  { %v212_v15 = vsub.f32 %v183_v12, %v211_v14 }
  0x3d   :  { %v225_v16 = vmul.f32 %v212_v15, %v141_v27 }
  0x3f   :  { %v226_v17 = vsel %vm214_vm2, %v225_v16, 0.0 }
  0x40   :  { %227 = vadd.xlane.f32.xlu0 %v226_v17 }
  0x7a   :  { %v238_v18 = vpop.xlane.xlu1 %237 }
  0x7b   :  { %v239_v21 = vrot.slane %v238_v18, 4 }
  0x7d   :  { %v240_v24 = vadd.f32 %v239_v21, %v238_v18 }
  0x7f   :  { %v241_v26 = vrot.slane %v240_v24, 2 }
  0x81   :  { %v242_v33 = vadd.f32 %v241_v26, %v240_v24 }
  0x83   :  { %v243_v35 = vrot.slane %v242_v33, 1 }
  0x85   :  { %v244_v38 = vadd.f32 %v243_v35, %v242_v33 }
  0xaa   :  { %v217_v19 = vpop.xlane.xlu0 %216 }
  0xab   :  { %v218_v20 = vrot.slane %v217_v19, 4 }
  0xad   :  { %v219_v22 = vadd.f32 %v218_v20, %v217_v19 }
  0xaf   :  { %v220_v23 = vrot.slane %v219_v22, 2 }
  0xb1   :  { %v221_v25 = vadd.f32 %v220_v23, %v219_v22 }
  0xb3   :  { %v228_v28 = vpop.xlane.xlu0 %227  ;;  %v222_v29 = vrot.slane %v221_v25, 1 }
  0xb4   :  { %v229_v30 = vrot.slane %v228_v28, 4 }
  0xb5   :  { %v223_v31 = vadd.f32 %v222_v29, %v221_v25 }
  0xb6   :  { %v230_v32 = vadd.f32 %v229_v30, %v228_v28 }
  0xb7   :  { %282 = vpush %v223_v31 }
  0xb8   :  { %v231_v27 = vrot.slane %v230_v32, 2 }
  0xba   :  { %v232_v34 = vadd.f32 %v231_v27, %v230_v32 }
  0xbc   :  { %v233_v36 = vrot.slane %v232_v34, 1 }
  0xbe   :  { %v234_v37 = vadd.f32 %v233_v36, %v232_v34 }
  0xc0   :  { %284 = vpush %v234_v37 }
  0xc1   :  { %286 = vpush %v244_v38 }
  0xe8   :  { %s283_s0 = spop %282 }
  0xe9   :  { %v247_v39 = vstv %s283_s0 }
  0xea   :  { %v248_v41 = vsel %vm246_vm3, %v247_v39, 0.0 }
  0xf1   :  { %s285_s3 = spop %284 }
  0xf2   :  { %v250_v40 = vstv %s285_s3  ;;  %s287_s4 = spop %286 }
  0xf3   :  { %v251_v42 = vsel %vm249_vm4, %v250_v40, 0.0  ;;  %v254_v43 = vstv %s287_s4 }
  0xf4   :  { %v252_v44 = vadd.f32 %v251_v42, %v248_v41  ;;  %v255_v45 = vsel %vm253_vm5, %v254_v43, 0.0 }
  0xf6   :  { %v256_v46 = vadd.f32 %v255_v45, %v252_v44 }
  0xf8   :  { %259 = vst [vmem:[%s370_s5] sm:$0xff] %v256_v46 }

</bundles_post_ra>
